<compile_context>
chip_gen: v7x
topology: tpu7x:2x2x1
jax: 0.10.0
libtpu: 0.0.40
codegen_flags: <defaults>
</compile_context>

<pallas_src>
import numpy as np
import jax
import jax.numpy as jnp
from jax.experimental import pallas as pl
from jax.experimental.pallas import tpu as pltpu


# ----------------------------------------------------------------------------
# Parameter setup (glue, plain NumPy): port of calculate_weights().
# ----------------------------------------------------------------------------
def calc_lambda(sigma, bandwidth):
    p = 2.0 ** bandwidth
    c = np.sqrt(np.log(2.0) / 2.0)
    return sigma * np.pi / c * (p - 1.0) / (p + 1.0)


def get_gabor_kernel(ksize, sigma, theta, lambd, gamma, psi):
    """NumPy port of cv2.getGaborKernel (ktype=CV_64F)."""
    width, height = ksize
    sigma_x = sigma
    sigma_y = sigma / gamma
    xmax = width // 2
    ymax = height // 2
    c, s = np.cos(theta), np.sin(theta)
    ex = -0.5 / (sigma_x * sigma_x)
    ey = -0.5 / (sigma_y * sigma_y)
    cscale = 2.0 * np.pi / lambd
    ys = np.arange(-ymax, ymax + 1, dtype=np.float64)
    xs = np.arange(-xmax, xmax + 1, dtype=np.float64)
    xg, yg = np.meshgrid(xs, ys)
    xr = xg * c + yg * s
    yr = -xg * s + yg * c
    v = np.exp(ex * xr * xr + ey * yr * yr) * np.cos(cscale * xr + psi)
    # cv2 writes kernel[ymax - y, xmax - x] = v(x, y)  ->  flip both axes.
    return v[::-1, ::-1].copy()


def gabor_filter_from_dict(input_dict):
    """The single (KH, KW) Gabor filter that calculate_weights() leaves in
    every (out_ch, in_ch) slot: the LAST loop combination wins."""
    ksize = tuple(input_dict['ksize'])
    sigma = input_dict['sigmas'][-1]
    theta = input_dict['thetas'][-1]
    b = input_dict['bs'][-1]
    gamma = input_dict['gammas'][-1]
    psi = input_dict['psis'][-1]
    lambd = calc_lambda(sigma, b)
    gf = get_gabor_kernel(ksize, sigma, theta, lambd, gamma, psi)  # (KH, KW)
    return np.ascontiguousarray(gf, dtype=np.float32)


# ----------------------------------------------------------------------------
# Pallas kernel (hot path): channel-sum + single-channel 2D VALID correlation.
# ----------------------------------------------------------------------------
def _make_gabor_kernel(gabor_np, KH, KW, OH, OW):
    # Gabor taps are compile-time constants: pure VPU scalar-broadcast FMAs.
    taps = [[float(gabor_np[kh, kw]) for kw in range(KW)] for kh in range(KH)]

    def kernel(x_ref, o_ref):
        # x_ref: (1, C, H, W) VMEM block (one full NCHW image)
        # o_ref: (1, OH, OW)  VMEM block (single-channel output slab)
        xs = jnp.sum(x_ref[0].astype(jnp.float32), axis=0)       # (H, W)
        acc = jnp.zeros((OH, OW), jnp.float32)
        for kh in range(KH):
            row = xs[kh:kh + OH, :]                              # (OH, W) sublane shift
            for kw in range(KW):
                acc = acc + row[:, kw:kw + OW] * taps[kh][kw]    # lane shift + FMA
        o_ref[0] = acc.astype(o_ref.dtype)

    return kernel


def gabor_conv_forward(x_nchw, gabor_np, out_channels):
    """GaborConvFixed.forward: VALID cross-correlation (stride=1, no padding,
    no bias) where every (oc, ic) filter equals `gabor_np`."""
    N, C, H, W = x_nchw.shape
    KH, KW = gabor_np.shape
    OH = H - KH + 1
    OW = W - KW + 1

    kernel = _make_gabor_kernel(gabor_np, KH, KW, OH, OW)

    y = pl.pallas_call(
        kernel,
        out_shape=jax.ShapeDtypeStruct((N, OH, OW), x_nchw.dtype),
        grid_spec=pltpu.PrefetchScalarGridSpec(
            num_scalar_prefetch=0,
            grid=(N,),
            in_specs=[pl.BlockSpec((1, C, H, W), lambda n: (n, 0, 0, 0))],
            out_specs=pl.BlockSpec((1, OH, OW), lambda n: (n, 0, 0)),
        ),
        compiler_params=pltpu.CompilerParams(
            dimension_semantics=("parallel",)),
    )(x_nchw)

    # Every output channel shares the identical filter -> broadcast outside
    # the kernel (no per-OC compute or stores inside the kernel).
    return jnp.broadcast_to(y[:, None, :, :], (N, out_channels, OH, OW))


if __name__ == "__main__":
    # Small shapes consistent with the module's forward.
    in_channels, out_channels = 4, 8
    kernel_size = 5
    # Same structure as the default input_dict, but ksize matches kernel_size
    # (required for weight.data[i, j] = gf to be well formed).
    input_dict = {
        'ksize': (kernel_size, kernel_size),
        'gammas': [0.5],
        'bs': np.linspace(1, 2.6, num=3).tolist(),
        'sigmas': [8],
        'thetas': np.linspace(0, np.pi, 4, endpoint=False).tolist(),
        'psis': [np.pi / 2, 3 * np.pi / 2],
    }

    gabor_np = gabor_filter_from_dict(input_dict)          # (5, 5) float32

    key = jax.random.PRNGKey(0)
    x = jax.random.normal(key, (2, in_channels, 16, 16), dtype=jnp.float32)

    out = gabor_conv_forward(x, gabor_np, out_channels)
    out = jax.block_until_ready(out)
    assert out.shape == (2, out_channels, 12, 12), out.shape

    # Reference: full broadcast OIHW weights through XLA's conv at highest
    # precision (exact-f32 path), with a tight fp32 tolerance.
    w_full = jnp.asarray(
        np.ascontiguousarray(
            np.broadcast_to(
                gabor_np[None, None],
                (out_channels, in_channels, kernel_size, kernel_size))))
    ref = jax.lax.conv_general_dilated(
        x, w_full, window_strides=(1, 1), padding='VALID',
        dimension_numbers=('NCHW', 'OIHW', 'NCHW'),
        precision=jax.lax.Precision.HIGHEST)
    np.testing.assert_allclose(np.asarray(out), np.asarray(ref),
                               rtol=1e-5, atol=1e-4)

    print("KERNEL_OK")
</pallas_src>

<mosaic_0001>
module attributes {stable_mosaic.version = 11 : i64} {
  func.func @kernel(%arg0: i32, %arg1: memref<1x4x16x16xf32, #tpu.memory_space<vmem>>, %arg2: memref<1x12x12xf32, #tpu.memory_space<vmem>>) attributes {dimension_semantics = [#tpu.dimension_semantics<parallel>], iteration_bounds = array<i64: 2>, scalar_prefetch = 0 : i64, scratch_operands = 0 : i64, tpu.core_type = #tpu.core_type<tc>, window_params = [{transform_indices = @transform_0, window_bounds = array<i64: 1, 4, 16, 16>}, {transform_indices = @transform_1, window_bounds = array<i64: 1, 12, 12>}]} {
    %c0 = arith.constant 0 : index
    %c0_0 = arith.constant 0 : index
    %c0_1 = arith.constant 0 : index
    %c0_2 = arith.constant 0 : index
    %0 = vector.load %arg1[%c0, %c0_0, %c0_1, %c0_2] : memref<1x4x16x16xf32, #tpu.memory_space<vmem>>, vector<1x4x16x16xf32>
    %1 = vector.shape_cast %0 : vector<1x4x16x16xf32> to vector<4x16x16xf32>
    %cst = arith.constant dense<0.000000e+00> : vector<16x16xf32>
    %2 = vector.multi_reduction <add>, %1, %cst [0] : vector<4x16x16xf32> to vector<16x16xf32>
    %cst_3 = arith.constant 0.000000e+00 : f32
    %3 = vector.broadcast %cst_3 : f32 to vector<12x12xf32>
    %4 = vector.extract_strided_slice %2 {offsets = [0, 0], sizes = [12, 16], strides = [1, 1]} : vector<16x16xf32> to vector<12x16xf32>
    %5 = vector.extract_strided_slice %4 {offsets = [0, 0], sizes = [12, 12], strides = [1, 1]} : vector<12x16xf32> to vector<12x12xf32>
    %cst_4 = arith.constant -1.80849065E-16 : f32
    %6 = vector.broadcast %cst_4 : f32 to vector<12x12xf32>
    %7 = arith.mulf %5, %6 : vector<12x12xf32>
    %8 = arith.addf %3, %7 : vector<12x12xf32>
    %9 = vector.extract_strided_slice %4 {offsets = [0, 1], sizes = [12, 12], strides = [1, 1]} : vector<12x16xf32> to vector<12x12xf32>
    %cst_5 = arith.constant 0.14284566 : f32
    %10 = vector.broadcast %cst_5 : f32 to vector<12x12xf32>
    %11 = arith.mulf %9, %10 : vector<12x12xf32>
    %12 = arith.addf %8, %11 : vector<12x12xf32>
    %13 = vector.extract_strided_slice %4 {offsets = [0, 2], sizes = [12, 12], strides = [1, 1]} : vector<12x16xf32> to vector<12x12xf32>
    %cst_6 = arith.constant 2.807600e-01 : f32
    %14 = vector.broadcast %cst_6 : f32 to vector<12x12xf32>
    %15 = arith.mulf %13, %14 : vector<12x12xf32>
    %16 = arith.addf %12, %15 : vector<12x12xf32>
    %17 = vector.extract_strided_slice %4 {offsets = [0, 3], sizes = [12, 12], strides = [1, 1]} : vector<12x16xf32> to vector<12x12xf32>
    %cst_7 = arith.constant 0.406928152 : f32
    %18 = vector.broadcast %cst_7 : f32 to vector<12x12xf32>
    %19 = arith.mulf %17, %18 : vector<12x12xf32>
    %20 = arith.addf %16, %19 : vector<12x12xf32>
    %21 = vector.extract_strided_slice %4 {offsets = [0, 4], sizes = [12, 12], strides = [1, 1]} : vector<12x16xf32> to vector<12x12xf32>
    %cst_8 = arith.constant 5.153870e-01 : f32
    %22 = vector.broadcast %cst_8 : f32 to vector<12x12xf32>
    %23 = arith.mulf %21, %22 : vector<12x12xf32>
    %24 = arith.addf %20, %23 : vector<12x12xf32>
    %25 = vector.extract_strided_slice %2 {offsets = [1, 0], sizes = [12, 16], strides = [1, 1]} : vector<16x16xf32> to vector<12x16xf32>
    %26 = vector.extract_strided_slice %25 {offsets = [0, 0], sizes = [12, 12], strides = [1, 1]} : vector<12x16xf32> to vector<12x12xf32>
    %cst_9 = arith.constant -0.14284566 : f32
    %27 = vector.broadcast %cst_9 : f32 to vector<12x12xf32>
    %28 = arith.mulf %26, %27 : vector<12x12xf32>
    %29 = arith.addf %24, %28 : vector<12x12xf32>
    %30 = vector.extract_strided_slice %25 {offsets = [0, 1], sizes = [12, 12], strides = [1, 1]} : vector<12x16xf32> to vector<12x12xf32>
    %cst_10 = arith.constant -1.82980848E-16 : f32
    %31 = vector.broadcast %cst_10 : f32 to vector<12x12xf32>
    %32 = arith.mulf %30, %31 : vector<12x12xf32>
    %33 = arith.addf %29, %32 : vector<12x12xf32>
    %34 = vector.extract_strided_slice %25 {offsets = [0, 2], sizes = [12, 12], strides = [1, 1]} : vector<12x16xf32> to vector<12x12xf32>
    %cst_11 = arith.constant 0.143966019 : f32
    %35 = vector.broadcast %cst_11 : f32 to vector<12x12xf32>
    %36 = arith.mulf %34, %35 : vector<12x12xf32>
    %37 = arith.addf %33, %36 : vector<12x12xf32>
    %38 = vector.extract_strided_slice %25 {offsets = [0, 3], sizes = [12, 12], strides = [1, 1]} : vector<12x16xf32> to vector<12x12xf32>
    %cst_12 = arith.constant 0.281858861 : f32
    %39 = vector.broadcast %cst_12 : f32 to vector<12x12xf32>
    %40 = arith.mulf %38, %39 : vector<12x12xf32>
    %41 = arith.addf %37, %40 : vector<12x12xf32>
    %42 = vector.extract_strided_slice %25 {offsets = [0, 4], sizes = [12, 12], strides = [1, 1]} : vector<12x16xf32> to vector<12x12xf32>
    %cst_13 = arith.constant 0.406928152 : f32
    %43 = vector.broadcast %cst_13 : f32 to vector<12x12xf32>
    %44 = arith.mulf %42, %43 : vector<12x12xf32>
    %45 = arith.addf %41, %44 : vector<12x12xf32>
    %46 = vector.extract_strided_slice %2 {offsets = [2, 0], sizes = [12, 16], strides = [1, 1]} : vector<16x16xf32> to vector<12x16xf32>
    %47 = vector.extract_strided_slice %46 {offsets = [0, 0], sizes = [12, 12], strides = [1, 1]} : vector<12x16xf32> to vector<12x12xf32>
    %cst_14 = arith.constant -2.807600e-01 : f32
    %48 = vector.broadcast %cst_14 : f32 to vector<12x12xf32>
    %49 = arith.mulf %47, %48 : vector<12x12xf32>
    %50 = arith.addf %45, %49 : vector<12x12xf32>
    %51 = vector.extract_strided_slice %46 {offsets = [0, 1], sizes = [12, 12], strides = [1, 1]} : vector<12x16xf32> to vector<12x12xf32>
    %cst_15 = arith.constant -0.143966019 : f32
    %52 = vector.broadcast %cst_15 : f32 to vector<12x12xf32>
    %53 = arith.mulf %51, %52 : vector<12x12xf32>
    %54 = arith.addf %50, %53 : vector<12x12xf32>
    %55 = vector.extract_strided_slice %46 {offsets = [0, 2], sizes = [12, 12], strides = [1, 1]} : vector<12x16xf32> to vector<12x12xf32>
    %cst_16 = arith.constant -1.83697015E-16 : f32
    %56 = vector.broadcast %cst_16 : f32 to vector<12x12xf32>
    %57 = arith.mulf %55, %56 : vector<12x12xf32>
    %58 = arith.addf %54, %57 : vector<12x12xf32>
    %59 = vector.extract_strided_slice %46 {offsets = [0, 3], sizes = [12, 12], strides = [1, 1]} : vector<12x16xf32> to vector<12x12xf32>
    %cst_17 = arith.constant 0.143966019 : f32
    %60 = vector.broadcast %cst_17 : f32 to vector<12x12xf32>
    %61 = arith.mulf %59, %60 : vector<12x12xf32>
    %62 = arith.addf %58, %61 : vector<12x12xf32>
    %63 = vector.extract_strided_slice %46 {offsets = [0, 4], sizes = [12, 12], strides = [1, 1]} : vector<12x16xf32> to vector<12x12xf32>
    %cst_18 = arith.constant 2.807600e-01 : f32
    %64 = vector.broadcast %cst_18 : f32 to vector<12x12xf32>
    %65 = arith.mulf %63, %64 : vector<12x12xf32>
    %66 = arith.addf %62, %65 : vector<12x12xf32>
    %67 = vector.extract_strided_slice %2 {offsets = [3, 0], sizes = [12, 16], strides = [1, 1]} : vector<16x16xf32> to vector<12x16xf32>
    %68 = vector.extract_strided_slice %67 {offsets = [0, 0], sizes = [12, 12], strides = [1, 1]} : vector<12x16xf32> to vector<12x12xf32>
    %cst_19 = arith.constant -0.406928152 : f32
    %69 = vector.broadcast %cst_19 : f32 to vector<12x12xf32>
    %70 = arith.mulf %68, %69 : vector<12x12xf32>
    %71 = arith.addf %66, %70 : vector<12x12xf32>
    %72 = vector.extract_strided_slice %67 {offsets = [0, 1], sizes = [12, 12], strides = [1, 1]} : vector<12x16xf32> to vector<12x12xf32>
    %cst_20 = arith.constant -0.281858861 : f32
    %73 = vector.broadcast %cst_20 : f32 to vector<12x12xf32>
    %74 = arith.mulf %72, %73 : vector<12x12xf32>
    %75 = arith.addf %71, %74 : vector<12x12xf32>
    %76 = vector.extract_strided_slice %67 {offsets = [0, 2], sizes = [12, 12], strides = [1, 1]} : vector<12x16xf32> to vector<12x12xf32>
    %cst_21 = arith.constant -0.143966019 : f32
    %77 = vector.broadcast %cst_21 : f32 to vector<12x12xf32>
    %78 = arith.mulf %76, %77 : vector<12x12xf32>
    %79 = arith.addf %75, %78 : vector<12x12xf32>
    %80 = vector.extract_strided_slice %67 {offsets = [0, 3], sizes = [12, 12], strides = [1, 1]} : vector<12x16xf32> to vector<12x12xf32>
    %cst_22 = arith.constant -1.82980848E-16 : f32
    %81 = vector.broadcast %cst_22 : f32 to vector<12x12xf32>
    %82 = arith.mulf %80, %81 : vector<12x12xf32>
    %83 = arith.addf %79, %82 : vector<12x12xf32>
    %84 = vector.extract_strided_slice %67 {offsets = [0, 4], sizes = [12, 12], strides = [1, 1]} : vector<12x16xf32> to vector<12x12xf32>
    %cst_23 = arith.constant 0.14284566 : f32
    %85 = vector.broadcast %cst_23 : f32 to vector<12x12xf32>
    %86 = arith.mulf %84, %85 : vector<12x12xf32>
    %87 = arith.addf %83, %86 : vector<12x12xf32>
    %88 = vector.extract_strided_slice %2 {offsets = [4, 0], sizes = [12, 16], strides = [1, 1]} : vector<16x16xf32> to vector<12x16xf32>
    %89 = vector.extract_strided_slice %88 {offsets = [0, 0], sizes = [12, 12], strides = [1, 1]} : vector<12x16xf32> to vector<12x12xf32>
    %cst_24 = arith.constant -5.153870e-01 : f32
    %90 = vector.broadcast %cst_24 : f32 to vector<12x12xf32>
    %91 = arith.mulf %89, %90 : vector<12x12xf32>
    %92 = arith.addf %87, %91 : vector<12x12xf32>
    %93 = vector.extract_strided_slice %88 {offsets = [0, 1], sizes = [12, 12], strides = [1, 1]} : vector<12x16xf32> to vector<12x12xf32>
    %cst_25 = arith.constant -0.406928152 : f32
    %94 = vector.broadcast %cst_25 : f32 to vector<12x12xf32>
    %95 = arith.mulf %93, %94 : vector<12x12xf32>
    %96 = arith.addf %92, %95 : vector<12x12xf32>
    %97 = vector.extract_strided_slice %88 {offsets = [0, 2], sizes = [12, 12], strides = [1, 1]} : vector<12x16xf32> to vector<12x12xf32>
    %cst_26 = arith.constant -2.807600e-01 : f32
    %98 = vector.broadcast %cst_26 : f32 to vector<12x12xf32>
    %99 = arith.mulf %97, %98 : vector<12x12xf32>
    %100 = arith.addf %96, %99 : vector<12x12xf32>
    %101 = vector.extract_strided_slice %88 {offsets = [0, 3], sizes = [12, 12], strides = [1, 1]} : vector<12x16xf32> to vector<12x12xf32>
    %cst_27 = arith.constant -0.14284566 : f32
    %102 = vector.broadcast %cst_27 : f32 to vector<12x12xf32>
    %103 = arith.mulf %101, %102 : vector<12x12xf32>
    %104 = arith.addf %100, %103 : vector<12x12xf32>
    %105 = vector.extract_strided_slice %88 {offsets = [0, 4], sizes = [12, 12], strides = [1, 1]} : vector<12x16xf32> to vector<12x12xf32>
    %cst_28 = arith.constant -1.80849065E-16 : f32
    %106 = vector.broadcast %cst_28 : f32 to vector<12x12xf32>
    %107 = arith.mulf %105, %106 : vector<12x12xf32>
    %108 = arith.addf %104, %107 : vector<12x12xf32>
    %c0_29 = arith.constant 0 : index
    %c0_30 = arith.constant 0 : index
    %c0_31 = arith.constant 0 : index
    %109 = vector.load %arg2[%c0_29, %c0_30, %c0_31] : memref<1x12x12xf32, #tpu.memory_space<vmem>>, vector<1x12x12xf32>
    %110 = vector.shape_cast %109 : vector<1x12x12xf32> to vector<12x12xf32>
    %111 = vector.shape_cast %108 : vector<12x12xf32> to vector<1x12x12xf32>
    tpu.vector_store %arg2[%c0_29, %c0_30, %c0_31], %111 {strides = array<i32>} : memref<1x12x12xf32, #tpu.memory_space<vmem>>, vector<1x12x12xf32>,
    return
  }
  func.func @transform_0(%arg0: i32) -> (i32, i32, i32, i32) {
    %c0_i32 = arith.constant 0 : i32
    %c0_i32_0 = arith.constant 0 : i32
    %c0_i32_1 = arith.constant 0 : i32
    %c0_i32_2 = arith.constant 0 : i32
    return %arg0, %c0_i32, %c0_i32_0, %c0_i32_1 : i32, i32, i32, i32
  }
  func.func @transform_1(%arg0: i32) -> (i32, i32, i32) {
    %c0_i32 = arith.constant 0 : i32
    %c0_i32_0 = arith.constant 0 : i32
    %c0_i32_1 = arith.constant 0 : i32
    return %arg0, %c0_i32, %c0_i32_0 : i32, i32, i32
  }
}

</mosaic_0001>

<bundles_post_ra>
// kernel: tpu_custom_call.1
= control target key start
LH: loop header
LB: loop body
LE: loop exit
PB: predicated region body
PF: predicated region fallthrough
CT: control target
= control target key end

     0   :  { %6 = vsyncpa [#allocation3], 0  ;;  %s971_s0 = inlined_call_operand.hbm [shape: f32[2,4,16,16], index: 0, kind: input, shape index: {}]   ;;  %s972_s1 = inlined_call_operand.vmem [shape: f32[2,12,12], index: 1, kind: output, shape index: {}]  }
   0x1   :  { %8 = vsyncpa [#allocation3 + $0x1], 0  ;;  %s675_s6 = smov 0   ;;  %s677_s7 = smov 0  }
   0x2   :  { %s679_s8 = smov 0   ;;  %s681_s9 = smov 0  }
   0x3 LB: > { %s694_s10 = sadd.s32 4294967295, %s656_s9   ;;  %s697_s11 = sadd.s32 1, %s656_s9   ;;  %s656_s9 = sphi %s681_s9, %s979_s9   ;;  %s652_s8 = sphi %s679_s8, %s978_s8   ;;  %s648_s7 = sphi %s677_s7, %s977_s7   ;;  %s644_s6 = sphi %s675_s6, %s976_s6  }
   0x4   : > { %s18_s12 = ssub.s32 %s656_s9, %s697_s11  ;;  %s21_s13 = sadd.s32 1, %s652_s8 }
   0x5   : > { %p19_p0 = scmp.eq.s32.totalorder %s18_s12, 0  ;;  %p28_p1 = scmp.ne.s32.totalorder %s652_s8, %s648_s7 }
   0x6   : > { %p29_p2 = scmp.eq.s32.totalorder %s656_s9, 0  ;;  %p34_p3 = scmp.ne.s32.totalorder %s648_s7, %s644_s6 }
   0x7   : > { %s707_s14 = scalar_select %p19_p0, %s652_s8, %s21_s13  }
   0x8   : > { %p30_p4 = por %p29_p2, %p28_p1  ;;  %p35_p5 = scmp.eq.s32.totalorder %s694_s10, 0 }
   0x9   : > { %p553_p6 = scmp.lt.s32.totalorder %s656_s9, 2  ;;  %s84_s16 = sand.u32 1, %s652_s8  }
   0xa   : > { %p711_p7 = por %p35_p5, %p34_p3  ;;  %s536_s17 = sshll.u32 %s84_s16, 6 }
   0xb   : > { %s545_s18 = sshll.u32 %s656_s9, 10  ;;  %s88_s22 = scalar_lea.vmem [#allocation2], %s536_s17 }
   0xc   : > { %s720_s21 = scalar_lea.hbm %s971_s0, %s545_s18  ;;  %s95_s23 = sshll.u32 %s88_s22, 4  ;;  %s722_s23 = int_to_ptr.vmem [resolvable:$true] %s95_s23 }
   0xd   : > { %p724_p8 = pnand %p553_p6, %p30_p4  ;;  %s729_s25 = scalar_lea.sflag [#allocation3], %s84_s16 }
   0xe   : > { %s592_s26 = scalar_lea.hbm %s720_s21, 1024  ;;  %s597_s29 = scalar_lea.hbm %s971_s0, 2048 }
   0xf   : > { %p593_p10 = scmp.ne.s32.totalorder %s720_s21, %s592_s26  ;;  %p594_p11 = pneg %p724_p8 }
  0x10   : > { %p598_p0 = scmp.lt.u32.totalorder %s720_s21, %s971_s0  ;;  %p599_p1 = scmp.lt.u32.totalorder %s597_s29, %s592_s26 }
  0x11   : > { %p595_p12 = pnand %p594_p11, %p593_p10  ;;  %p601_p3 = scmp.lt.u32.totalorder %s592_s26, %s720_s21 }
  0x12   : > { %p600_p2 = por %p599_p1, %p598_p0 }
  0x13   : > { %p596_p13 = pneg %p595_p12 }
  0x14   : > { %p602_p4 = por %p601_p3, %p600_p2 }
  0x16   : > { %p603_p5 = pnand %p602_p4, %p596_p13 }
  0x18   : > { %606 = shalt.err (!%p603_p5)
}
  0x19   : > { %s607_s3 = scalar_lea.vmem %s722_s23, 1024  ;;  %s658_s4 = smov [#allocation2]  }
  0x1a   : > { %p608_p6 = scmp.ne.s32.totalorder %s722_s23, %s607_s3  ;;  %s612_s5 = sshll.u32 %s658_s4, 4  ;;  %s613_s5 = int_to_ptr.vmem [resolvable:$false] %s612_s5 }
  0x1b   : > { %s614_s6 = scalar_lea.vmem %s613_s5, 2048  ;;  %p615_p9 = scmp.lt.s32.totalorder %s722_s23, %s613_s5 }
  0x1c   : > { %p610_p10 = pnand %p608_p6, %p594_p11  ;;  %p616_p0 = scmp.lt.s32.totalorder %s614_s6, %s607_s3 }
  0x1e   : > { %p611_p12 = pneg %p610_p10  ;;  %p617_p1 = por %p616_p0, %p615_p9 }
  0x20   : > { %p618_p2 = pnand %p617_p1, %p611_p12 }
  0x22   : > { %621 = shalt.err (!%p618_p2)
}
  0x23   : > { %s659_s12 = smov 128   ;;  %s660_s13 = smov 8  }
  0x24   : > { %552 = dma.hbm_to_vmem [thread:$0]  (!%p724_p8), %s720_s21, 1024, %s722_s23, %s729_s25, %s659_s12, %s659_s12, %s660_s13  }
  0x25   : > { %p103_p11 = scmp.lt.s32.totalorder %s656_s9, 3  ;;  %p975_p13 = scmp.ge.s32.totalorder %s656_s9, 1 }
  0x27   : > { %p104_p3 = pnand %p975_p13, %p103_p11 }
  0x28   : > { %s109_s16 = sand.u32 (!%p104_p3), 1, %s648_s7  }
  0x29   : > { %107 = sbr.rel (%p104_p3) target bundleno = 254 (0xfe), region = 24  ;;  %s540_s17 = sshll.u32 (!%p104_p3), %s109_s16, 6 }
  0x2a   : > { %s110_s18 = scalar_lea.sflag (!%p104_p3), [#allocation3], %s109_s16  ;;  %s113_s19 = scalar_lea.vmem (!%p104_p3), [#allocation2], %s540_s17 }
  0x30   : > { %639 = dma.done.wait (%p711_p7), %s110_s18, 1024  }
  0x31   : > { %641 = vsyncadd (%p711_p7), %s110_s18, 4294966272  ;;  %vm145_vm0 = vcmask 130048   ;;  %v137_v0 = vld [vmem:[%s113_s19] sm:$0xff]  ;;  %v139_v1 = vld [vmem:[%s113_s19 + $0x10] sm:$0xff]  ;;  %s661_s9 = smov 126   ;;  %s662_s15 = smov 127  }
  0x32   : > { %v141_v2 = vld [vmem:[%s113_s19 + $0x20] sm:$0xff]  ;;  %v143_v3 = vld [vmem:[%s113_s19 + $0x30] sm:$0xff]  ;;  %v146_v4 = vsel %vm145_vm0, %v137_v0, 0.0  ;;  %v147_v5 = vsel %vm145_vm0, %v139_v1, 0.0  ;;  %v138_v7 = vld [vmem:[%s113_s19 + $0x8] sm:$0xff]  ;;  %s663_s20 = smov 125  }
  0x33   : > { %v149_v6 = vsel %vm145_vm0, %v141_v2, 0.0  ;;  %v140_v8 = vld [vmem:[%s113_s19 + $0x18] sm:$0xff]  ;;  %v148_v9 = vadd.f32 %v147_v5, %v146_v4  ;;  %v142_v10 = vld [vmem:[%s113_s19 + $0x28] sm:$0xff]  ;;  %v153_v12 = vsel %vm145_vm0, %v138_v7, 0.0  ;;  %v151_v14 = vsel %vm145_vm0, %v143_v3, 0.0  ;;  %s664_s21 = smov 124  }
  0x34   : > { %v144_v11 = vld [vmem:[%s113_s19 + $0x38] sm:$0xff]  ;;  %v154_v13 = vsel %vm145_vm0, %v140_v8, 0.0  ;;  %v156_v16 = vsel %vm145_vm0, %v142_v10, 0.0  ;;  %vm216_vm1 = vcmask 1046528   ;;  %vm408_vm2 = vcmask 1043456   ;;  %p132_p7 = scmp.lt.s32.totalorder %s694_s10, 1 }
  0x35   : > { %v155_v15 = vadd.f32 %v154_v13, %v153_v12  ;;  %v150_v17 = vadd.f32 %v149_v6, %v148_v9  ;;  %v158_v18 = vsel %vm145_vm0, %v144_v11, 0.0  ;;  %vm284_vm3 = vcmask 1045504  }
  0x36   : > { %vm348_vm4 = vcmask 1044480   ;;  %s981_s10 = smov (!%p132_p7, %s694_s10), 1  ;;  %vm464_vm5 = vcmask 93184   ;;  %vm462_vm6 = vcmask 97280  }
  0x37   : > { %v157_v19 = vadd.f32 %v156_v16, %v155_v15  ;;  %v773_v20 = vadd.f32 %v151_v14, %v150_v17  ;;  %s546_s22 = sshll.u32 %s981_s10, 4 }
  0x38   : > { %s136_s25 = scalar_lea.vmem %s972_s1, %s546_s22 }
  0x39   : > { %v775_v21 = vadd.f32 %v158_v18, %v157_v19  ;;  %v778_v22 = vmul.f32 0.28076, %v773_v20  ;;  %v781_v23 = vmul.f32 0.14284566, %v773_v20  ;;  %v188_v27 = vmul.f32 0.40692815, %v773_v20 }
  0x3a   : > { %v803_v29 = vmul.f32 -1.8298085e-16, %v773_v20  ;;  %v200_v31 = vmul.f32 0.515387, %v773_v20  ;;  %v815_v35 = vmul.f32 0.14396602, %v773_v20 }
  0x3b   : > { %180 = vrot.lane.b32.xlu1 %v778_v22, %s661_s9  ;;  %168 = vrot.lane.b32.xlu0 %v781_v23, %s662_s15  ;;  %v788_v24 = vmul.f32 0.28076, %v775_v21  ;;  %v791_v25 = vmul.f32 0.14284566, %v775_v21  ;;  %v189_v26 = vmul.f32 0.40692815, %v775_v21 }
  0x3c   : > { %v800_v28 = vmul.f32 -1.8298085e-16, %v775_v21  ;;  %v201_v30 = vmul.f32 0.515387, %v775_v21  ;;  %v228_v33 = vrot.slane %v803_v29, 1  ;;  %v243_v39 = vrot.slane %v815_v35, 1 }
  0x3d   : > { %v812_v34 = vmul.f32 0.14396602, %v775_v21  ;;  %v255_v36 = vmul.f32 0.28185886, %v775_v21  ;;  %v254_v40 = vmul.f32 0.28185886, %v773_v20 }
  0x3e   : > { %v229_v32 = vrot.slane %v800_v28, 1  ;;  %v825_v41 = vmul.f32 -0.28076, %v775_v21  ;;  %v828_v42 = vmul.f32 -0.14284566, %v775_v21  ;;  %v269_v56 = vrot.slane %v188_v27, 1 }
  0x3f   : > { %182 = vrot.lane.b32.xlu1 %v788_v24, %s661_s9  ;;  %170 = vrot.lane.b32.xlu0 %v791_v25, %s662_s15  ;;  %v244_v38 = vrot.slane %v812_v34, 1  ;;  %v259_v43 = vrot.slane %v255_v36, 1  ;;  %v212_v44 = vmul.f32 -0.14284566, %v773_v20  ;;  %v834_v45 = vmul.f32 -0.28076, %v773_v20 }
  0x40   : > { %v230_v37 = vsel %vm216_vm1, %v228_v33, %v229_v32  ;;  %v439_v46 = vrot.slane %v828_v42, 4  ;;  %v218_v47 = vrot.slane %v828_v42, 1  ;;  %v286_v48 = vrot.slane %v825_v41, 2 }
  0x41   : > { %v245_v49 = vsel %vm216_vm1, %v243_v39, %v244_v38  ;;  %v258_v50 = vrot.slane %v254_v40, 1  ;;  %v438_v51 = vrot.slane %v212_v44, 4  ;;  %v217_v52 = vrot.slane %v212_v44, 1 }
  0x42   : > { %v285_v53 = vrot.slane %v834_v45, 2  ;;  %v270_v57 = vrot.slane %v189_v26, 1  ;;  %v293_v60 = vmul.f32 -0.14396602, %v775_v21  ;;  %v292_v61 = vmul.f32 -0.14396602, %v773_v20 }
  0x43   : > { %194 = vrot.lane.b32.xlu1 %v189_v26, %s663_s20  ;;  %192 = vrot.lane.b32.xlu0 %v188_v27, %s663_s20  ;;  %v844_v54 = vsel %vm408_vm2, %v438_v51, %v439_v46  ;;  %v849_v55 = vsel %vm216_vm1, %v217_v52, %v218_v47  ;;  %v260_v59 = vsel %vm216_vm1, %v258_v50, %v259_v43  ;;  %v308_v1 = vmul.f32 -1.8369701e-16, %v775_v21 }
  0x44   : > { %v856_v58 = vsel %vm284_vm3, %v285_v53, %v286_v48  ;;  %v271_v62 = vsel %vm216_vm1, %v269_v56, %v270_v57  ;;  %v297_v63 = vrot.slane %v293_v60, 2  ;;  %v296_v0 = vrot.slane %v292_v61, 2 }
  0x45   : > { %v307_v2 = vmul.f32 -1.8369701e-16, %v773_v20  ;;  %v869_v3 = vmul.f32 -0.40692815, %v775_v21  ;;  %v344_v4 = vmul.f32 -0.40692815, %v773_v20 }
  0x46   : > { %v298_v5 = vsel %vm284_vm3, %v296_v0, %v297_v63  ;;  %v312_v6 = vrot.slane %v308_v1, 2  ;;  %v323_v12 = vrot.slane %v812_v34, 2  ;;  %v322_v13 = vrot.slane %v815_v35, 2 }
  0x47   : > { %206 = vrot.lane.b32.xlu1 %v201_v30, %s664_s21  ;;  %204 = vrot.lane.b32.xlu0 %v200_v31, %s664_s21  ;;  %v311_v7 = vrot.slane %v307_v2, 2  ;;  %v350_v8 = vrot.slane %v869_v3, 3  ;;  %v349_v9 = vrot.slane %v344_v4, 3  ;;  %v333_v14 = vrot.slane %v778_v22, 2 }
  0x48   : > { %v324_v15 = vsel %vm284_vm3, %v322_v13, %v323_v12  ;;  %v334_v16 = vrot.slane %v788_v24, 2  ;;  %v357_v17 = vmul.f32 -0.28185886, %v775_v21  ;;  %v356_v18 = vmul.f32 -0.28185886, %v773_v20 }
  0x49   : > { %v879_v10 = vsel %vm348_vm4, %v349_v9, %v350_v8  ;;  %v313_v11 = vsel %vm284_vm3, %v311_v7, %v312_v6  ;;  %v897_v27 = vmul.f32 -0.515387, %v775_v21  ;;  %v404_v24 = vmul.f32 -0.515387, %v773_v20 }
  0x4a   : > { %v335_v19 = vsel %vm284_vm3, %v333_v14, %v334_v16  ;;  %v361_v26 = vrot.slane %v357_v17, 3  ;;  %v360_v22 = vrot.slane %v356_v18, 3  ;;  %v372_v31 = vrot.slane %v293_v60, 3 }
  0x4b   : > { %233 = vrot.lane.b32.xlu1 %v229_v32, %s662_s15  ;;  %231 = vrot.lane.b32.xlu0 %v230_v37, %s662_s15  ;;  %v371_v32 = vrot.slane %v292_v61, 3  ;;  %v410_v33 = vrot.slane %v897_v27, 4  ;;  %v409_v34 = vrot.slane %v404_v24, 4  ;;  %v383_v37 = vrot.slane %v800_v28, 3 }
  0x4c   : > { %v362_v30 = vsel %vm348_vm4, %v360_v22, %v361_v26  ;;  %v393_v39 = vrot.slane %v781_v23, 3  ;;  %v417_v28 = vrot.slane %v869_v3, 4  ;;  %v428_v23 = vrot.slane %v825_v41, 4 }
  0x4d   : > { %v907_v35 = vsel %vm408_vm2, %v409_v34, %v410_v33  ;;  %v373_v36 = vsel %vm348_vm4, %v371_v32, %v372_v31  ;;  %v427_v50 = vrot.slane %v834_v45, 4  ;;  %v161_v51 = vmul.f32 -1.8084906e-16, %v775_v21 }
  0x4e   : > { %v160_v52 = vmul.f32 -1.8084906e-16, %v773_v20 }
  0x4f   : > { %248 = vrot.lane.b32.xlu1 %v244_v38, %s661_s9  ;;  %246 = vrot.lane.b32.xlu0 %v245_v49, %s661_s9  ;;  %v382_v38 = vrot.slane %v803_v29, 3  ;;  %v416_v49 = vrot.slane %v344_v4, 4  ;;  %v452_v53 = vrot.slane %v161_v51, 4 }
  0x50   : > { %v451_v56 = vrot.slane %v160_v52, 4 }
  0x51   : > { %v384_v40 = vsel %vm348_vm4, %v382_v38, %v383_v37  ;;  %v418_v29 = vsel %vm408_vm2, %v416_v49, %v417_v28 }
  0x52   : > { %v453_v45 = vsel %vm408_vm2, %v451_v56, %v452_v53 }
  0x53   : > { %263 = vrot.lane.b32.xlu1 %v259_v43, %s663_s20  ;;  %261 = vrot.lane.b32.xlu0 %v260_v59, %s663_s20  ;;  %v394_v43 = vrot.slane %v791_v25, 3  ;;  %v429_v25 = vsel %vm408_vm2, %v427_v50, %v428_v23 }
  0x55   : > { %v395_v44 = vsel %vm348_vm4, %v393_v39, %v394_v43 }
  0x57   : > { %274 = vrot.lane.b32.xlu1 %v270_v57, %s664_s21  ;;  %272 = vrot.lane.b32.xlu0 %v271_v62, %s664_s21 }
  0x5b   : > { %301 = vrot.lane.b32.xlu1 %v297_v63, %s662_s15  ;;  %299 = vrot.lane.b32.xlu0 %v298_v5, %s662_s15 }
  0x5f   : > { %316 = vrot.lane.b32.xlu1 %v312_v6, %s661_s9  ;;  %314 = vrot.lane.b32.xlu0 %v313_v11, %s661_s9 }
  0x63   : > { %327 = vrot.lane.b32.xlu1 %v323_v12, %s663_s20  ;;  %325 = vrot.lane.b32.xlu0 %v324_v15, %s663_s20 }
  0x67   : > { %338 = vrot.lane.b32.xlu1 %v334_v16, %s664_s21  ;;  %336 = vrot.lane.b32.xlu0 %v335_v19, %s664_s21 }
  0x6b   : > { %365 = vrot.lane.b32.xlu1 %v361_v26, %s662_s15  ;;  %363 = vrot.lane.b32.xlu0 %v362_v30, %s662_s15 }
  0x6f   : > { %376 = vrot.lane.b32.xlu1 %v372_v31, %s661_s9  ;;  %374 = vrot.lane.b32.xlu0 %v373_v36, %s661_s9 }
  0x73   : > { %387 = vrot.lane.b32.xlu1 %v383_v37, %s663_s20  ;;  %385 = vrot.lane.b32.xlu0 %v384_v40, %s663_s20 }
  0x77   : > { %398 = vrot.lane.b32.xlu1 %v394_v43, %s664_s21  ;;  %396 = vrot.lane.b32.xlu0 %v395_v44, %s664_s21 }
  0x7b   : > { %421 = vrot.lane.b32.xlu1 %v417_v28, %s662_s15  ;;  %419 = vrot.lane.b32.xlu0 %v418_v29, %s662_s15 }
  0x7f   : > { %432 = vrot.lane.b32.xlu1 %v428_v23, %s661_s9  ;;  %430 = vrot.lane.b32.xlu0 %v429_v25, %s661_s9 }
  0x83   : > { %443 = vrot.lane.b32.xlu1 %v439_v46, %s663_s20  ;;  %441 = vrot.lane.b32.xlu0 %v844_v54, %s663_s20 }
  0x87   : > { %456 = vrot.lane.b32.xlu1 %v452_v53, %s664_s21  ;;  %454 = vrot.lane.b32.xlu0 %v453_v45, %s664_s21 }
  0xad   : > { %v181_v20 = vpop.permute.xlu1 %180  ;;  %v169_v21 = vpop.permute.xlu0 %168 }
  0xae   : > { %v174_v61 = vadd.f32 %v169_v21, %v160_v52 }
  0xb0   : > { %v186_v1 = vadd.f32 %v181_v20, %v174_v61 }
  0xb1   : > { %v183_v57 = vpop.permute.xlu1 %182  ;;  %v171_v59 = vpop.permute.xlu0 %170 }
  0xb2   : > { %v175_v60 = vadd.f32 %v171_v59, %v161_v51 }
  0xb4   : > { %v187_v0 = vadd.f32 %v183_v57, %v175_v60 }
  0xb5   : > { %v195_v62 = vpop.permute.xlu1 %194  ;;  %v193_v63 = vpop.permute.xlu0 %192 }
  0xb6   : > { %v199_v4 = vadd.f32 %v195_v62, %v187_v0  ;;  %v198_v54 = vadd.f32 %v193_v63, %v186_v1 }
  0xb9   : > { %v207_v46 = vpop.permute.xlu1 %206  ;;  %v205_v2 = vpop.permute.xlu0 %204 }
  0xba   : > { %v211_v5 = vadd.f32 %v207_v46, %v199_v4  ;;  %v210_v6 = vadd.f32 %v205_v2, %v198_v54 }
  0xbc   : > { %v223_v11 = vadd.f32 %v218_v47, %v211_v5  ;;  %v222_v12 = vadd.f32 %v849_v55, %v210_v6 }
  0xbd   : > { %v234_v7 = vpop.permute.xlu1 %233  ;;  %v232_v9 = vpop.permute.xlu0 %231 }
  0xbe   : > { %v238_v15 = vadd.f32 %v234_v7, %v223_v11  ;;  %v237_v16 = vadd.f32 %v232_v9, %v222_v12 }
  0xc1   : > { %v249_v13 = vpop.permute.xlu1 %248  ;;  %v247_v14 = vpop.permute.xlu0 %246 }
  0xc2   : > { %v253_v19 = vadd.f32 %v249_v13, %v238_v15  ;;  %v252_v26 = vadd.f32 %v247_v14, %v237_v16 }
  0xc5   : > { %v264_v17 = vpop.permute.xlu1 %263  ;;  %v262_v18 = vpop.permute.xlu0 %261 }
  0xc6   : > { %v268_v22 = vadd.f32 %v264_v17, %v253_v19  ;;  %v267_v24 = vadd.f32 %v262_v18, %v252_v26 }
  0xc9   : > { %v275_v30 = vpop.permute.xlu1 %274  ;;  %v273_v31 = vpop.permute.xlu0 %272 }
  0xca   : > { %v279_v32 = vadd.f32 %v275_v30, %v268_v22  ;;  %v278_v34 = vadd.f32 %v273_v31, %v267_v24 }
  0xcc   : > { %v291_v42 = vadd.f32 %v286_v48, %v279_v32  ;;  %v290_v47 = vadd.f32 %v856_v58, %v278_v34 }
  0xcd   : > { %v302_v55 = vpop.permute.xlu1 %301  ;;  %v300_v36 = vpop.permute.xlu0 %299 }
  0xce   : > { %v306_v39 = vadd.f32 %v302_v55, %v291_v42  ;;  %v305_v40 = vadd.f32 %v300_v36, %v290_v47 }
  0xd1   : > { %v317_v37 = vpop.permute.xlu1 %316  ;;  %v315_v38 = vpop.permute.xlu0 %314 }
  0xd2   : > { %v321_v28 = vadd.f32 %v317_v37, %v306_v39  ;;  %v320_v49 = vadd.f32 %v315_v38, %v305_v40 }
  0xd5   : > { %v328_v43 = vpop.permute.xlu1 %327  ;;  %v326_v44 = vpop.permute.xlu0 %325 }
  0xd6   : > { %v332_v29 = vadd.f32 %v328_v43, %v321_v28  ;;  %v331_v23 = vadd.f32 %v326_v44, %v320_v49 }
  0xd9   : > { %v339_v50 = vpop.permute.xlu1 %338  ;;  %v337_v25 = vpop.permute.xlu0 %336 }
  0xda   : > { %v343_v51 = vadd.f32 %v339_v50, %v332_v29  ;;  %v342_v52 = vadd.f32 %v337_v25, %v331_v23 }
  0xdc   : > { %v355_v41 = vadd.f32 %v350_v8, %v343_v51  ;;  %v354_v48 = vadd.f32 %v879_v10, %v342_v52 }
  0xdd   : > { %v366_v58 = vpop.permute.xlu1 %365  ;;  %v364_v53 = vpop.permute.xlu0 %363 }
  0xde   : > { %v370_v20 = vadd.f32 %v366_v58, %v355_v41  ;;  %v369_v21 = vadd.f32 %v364_v53, %v354_v48 }
  0xe1   : > { %v377_v56 = vpop.permute.xlu1 %376  ;;  %v375_v45 = vpop.permute.xlu0 %374 }
  0xe2   : > { %v381_v60 = vadd.f32 %v377_v56, %v370_v20  ;;  %v380_v61 = vadd.f32 %v375_v45, %v369_v21 }
  0xe5   : > { %v388_v57 = vpop.permute.xlu1 %387  ;;  %v386_v59 = vpop.permute.xlu0 %385 }
  0xe6   : > { %v392_v62 = vadd.f32 %v388_v57, %v381_v60  ;;  %v391_v63 = vadd.f32 %v386_v59, %v380_v61 }
  0xe9   : > { %v399_v0 = vpop.permute.xlu1 %398  ;;  %v397_v1 = vpop.permute.xlu0 %396 }
  0xea   : > { %v403_v3 = vadd.f32 %v399_v0, %v392_v62  ;;  %v402_v8 = vadd.f32 %v397_v1, %v391_v63 }
  0xec   : > { %v415_v10 = vadd.f32 %v410_v33, %v403_v3  ;;  %v414_v46 = vadd.f32 %v907_v35, %v402_v8 }
  0xed   : > { %v422_v2 = vpop.permute.xlu1 %421  ;;  %v420_v4 = vpop.permute.xlu0 %419 }
  0xee   : > { %v426_v6 = vadd.f32 %v422_v2, %v415_v10  ;;  %v425_v7 = vadd.f32 %v420_v4, %v414_v46 }
  0xf1   : > { %v433_v54 = vpop.permute.xlu1 %432  ;;  %v431_v5 = vpop.permute.xlu0 %430 }
  0xf2   : > { %v437_v12 = vadd.f32 %v433_v54, %v426_v6  ;;  %v436_v13 = vadd.f32 %v431_v5, %v425_v7 }
  0xf5   : > { %v444_v9 = vpop.permute.xlu1 %443  ;;  %v442_v11 = vpop.permute.xlu0 %441 }
  0xf6   : > { %v448_v14 = vadd.f32 %v444_v9, %v437_v12  ;;  %v447_v15 = vadd.f32 %v442_v11, %v436_v13 }
  0xf9   : > { %v457_v27 = vpop.permute.xlu1 %456  ;;  %v455_v33 = vpop.permute.xlu0 %454 }
  0xfa   : > { %v461_v35 = vadd.f32 %v457_v27, %v448_v14  ;;  %v460_v16 = vadd.f32 %v455_v33, %v447_v15 }
  0xfc   : > { %465 = vst.msk [vmem:[%s136_s25 + $0x8] sm:$0xf] %vm464_vm5, %v461_v35 }
  0xfd   : > { %463 = vst.msk [vmem:[%s136_s25] sm:$0xff] %vm462_vm6, %v460_v16 }
  0xfe PF: > { %p11_p8 = scmp.ge.s32.totalorder %s697_s11, 4   ;;  %s976_s6 = smov %s648_s7 }
  0xff   : > { %s977_s7 = smov %s652_s8  ;;  %s978_s8 = smov %s707_s14 }
 0x100   : > { %s979_s9 = smov %s697_s11  ;;  %13 = sbr.rel (!%p11_p8) target bundleno = 3 (0x3), region = 64 }
 0x107   :  { %487 = vsyncpa [#allocation3], 1 }
 0x108   :  { %489 = vsyncpa [#allocation3 + $0x1], 1 }

</bundles_post_ra>
